<compile_context>
chip_gen: v7x
topology: tpu7x:2x2x1
jax: 0.10.0
libtpu: 0.0.40
codegen_flags: <defaults>
</compile_context>

<pallas_src>
import functools

import jax
import jax.numpy as jnp
from jax.experimental import pallas as pl
from jax.experimental.pallas import tpu as pltpu


def _mlp_kernel(x_ref, w1t_ref, b1_ref, w2t_ref, b2_ref, o_ref):
    # x_ref:   (C_in, T)      -- tokens on lanes, channels on sublanes
    # w1t_ref: (C_hid, C_in)  b1_ref: (C_hid, 1)
    # w2t_ref: (C_out, C_hid) b2_ref: (C_out, 1)
    # o_ref:   (C_out, T)
    x = x_ref[...]
    h = jnp.dot(w1t_ref[...], x, preferred_element_type=jnp.float32)
    h = h + b1_ref[...]                       # bias broadcast over tokens (lanes)
    h = jnp.clip(h, 0.0, 6.0)                 # ReLU6
    # dropout(p=0.0) == identity
    o = jnp.dot(w2t_ref[...], h, preferred_element_type=jnp.float32)
    o = o + b2_ref[...]
    # dropout(p=0.0) == identity
    o_ref[...] = o.astype(o_ref.dtype)


def _round_up(v, m):
    return (v + m - 1) // m * m


def _pick_tile_tokens(HW, C_in, C_hid, C_out, max_tile_tokens,
                      vmem_budget_bytes=8 * 1024 * 1024):
    """Largest lane-aligned token tile fitting a conservative VMEM budget."""
    if HW <= max_tile_tokens:
        return HW
    # f32 bytes per token held in VMEM:
    #   x tile + out tile, each double-buffered by the pipeline, plus ~2 live
    #   copies of the (C_hid, T) hidden activations inside the kernel body.
    # Sublane dims pad to multiples of 8.
    per_tok = 4 * (2 * _round_up(C_in, 8)
                   + 2 * _round_up(C_out, 8)
                   + 2 * _round_up(C_hid, 8))
    cap = max(128, (vmem_budget_bytes // per_tok) // 128 * 128)
    return min(max_tile_tokens, cap)


@functools.partial(jax.jit, static_argnames=("max_tile_tokens",))
def mlp_pallas(x_nchw, w1, b1, w2, b2, max_tile_tokens=16384):
    """x_nchw: (N, C_in, H, W).  w1: (C_in, C_hid), b1: (C_hid,),
    w2: (C_hid, C_out), b2: (C_out,).  Returns (N, C_out, H, W)."""
    N, C_in, H, W = x_nchw.shape
    C_hid = w1.shape[1]
    C_out = w2.shape[1]
    HW = H * W

    # Free view: NCHW -> (N, C_in, H*W).  No HBM transpose.
    x3 = x_nchw.reshape(N, C_in, HW)

    # Token tile: whole spatial extent when it fits (one grid step per batch
    # element), otherwise a lane-aligned (multiple of 128) tile sized by VMEM
    # budget; pad the ragged tail only when needed (rare for typical decode
    # head resolutions, which are powers of two).
    tile_t = _pick_tile_tokens(HW, C_in, C_hid, C_out, max_tile_tokens)
    HW_p = pl.cdiv(HW, tile_t) * tile_t
    if HW_p != HW:
        # TODO(synk): could rely on Pallas ragged-edge masking instead of an
        #             explicit HBM pad; kept explicit for guaranteed semantics.
        x3 = jnp.pad(x3, ((0, 0), (0, 0), (0, HW_p - HW)))

    grid = (N, HW_p // tile_t)

    # Weights in "left-multiply" form; biases as (C, 1) columns that broadcast
    # across the lane (token) axis.
    w1t = jnp.transpose(w1)            # (C_hid, C_in)   -- tiny
    w2t = jnp.transpose(w2)            # (C_out, C_hid)  -- tiny
    b1c = b1.reshape(C_hid, 1)
    b2c = b2.reshape(C_out, 1)

    out3 = pl.pallas_call(
        _mlp_kernel,
        out_shape=jax.ShapeDtypeStruct((N, C_out, HW_p), x_nchw.dtype),
        grid_spec=pltpu.PrefetchScalarGridSpec(
            num_scalar_prefetch=0,
            grid=grid,
            in_specs=[
                # x tile: (C_in, tile_t), batch dim squeezed out
                pl.BlockSpec((None, C_in, tile_t), lambda n, t: (n, 0, t)),
                # Weight/bias blocks are identical for every grid point, so the
                # pipeline fetches them once and reuses the buffer.
                pl.BlockSpec((C_hid, C_in), lambda n, t: (0, 0)),   # W1^T
                pl.BlockSpec((C_hid, 1), lambda n, t: (0, 0)),      # b1
                pl.BlockSpec((C_out, C_hid), lambda n, t: (0, 0)),  # W2^T
                pl.BlockSpec((C_out, 1), lambda n, t: (0, 0)),      # b2
            ],
            out_specs=pl.BlockSpec((None, C_out, tile_t), lambda n, t: (n, 0, t)),
        ),
        compiler_params=pltpu.CompilerParams(
            dimension_semantics=("parallel", "parallel"),
        ),
    )(x3, w1t, b1c, w2t, b2c)

    if HW_p != HW:
        out3 = out3[:, :, :HW]

    # Free view back: (N, C_out, H*W) -> NCHW.
    return out3.reshape(N, C_out, H, W)


def mlp_reference(x_nchw, w1, b1, w2, b2):
    """Plain-JAX reference matching the PyTorch forward."""
    x = jnp.transpose(x_nchw, (0, 2, 3, 1))          # NHWC
    h = jnp.einsum("nhwc,cd->nhwd", x, w1) + b1
    h = jnp.clip(h, 0.0, 6.0)
    o = jnp.einsum("nhwd,de->nhwe", h, w2) + b2
    return jnp.transpose(o, (0, 3, 1, 2))            # NCHW


if __name__ == "__main__":
    # Module config: in_features=4, hidden_features=32, out_features=4
    N, C_in, H, W = 2, 4, 16, 16
    C_hid, C_out = 32, 4

    key = jax.random.PRNGKey(0)
    kx, k1, kb1, k2, kb2 = jax.random.split(key, 5)

    x = jax.random.normal(kx, (N, C_in, H, W), dtype=jnp.float32)
    # PyTorch Conv2d(k=1) weight is (out, in, 1, 1); we store the transposed
    # (in, out) matmul form directly.
    w1 = jax.random.normal(k1, (C_in, C_hid), dtype=jnp.float32) * 0.1
    b1 = jax.random.normal(kb1, (C_hid,), dtype=jnp.float32) * 0.1
    w2 = jax.random.normal(k2, (C_hid, C_out), dtype=jnp.float32) * 0.1
    b2 = jax.random.normal(kb2, (C_out,), dtype=jnp.float32) * 0.1

    out = mlp_pallas(x, w1, b1, w2, b2)
    out = jax.block_until_ready(out)

    ref = mlp_reference(x, w1, b1, w2, b2)
    assert out.shape == (N, C_out, H, W)
    assert jnp.allclose(out, ref, atol=1e-5, rtol=1e-5), "mismatch vs reference"

    print("KERNEL_OK")
</pallas_src>

<mosaic_0001>
module attributes {stable_mosaic.version = 11 : i64} {
  func.func @_mlp_kernel(%arg0: i32, %arg1: i32, %arg2: memref<1x4x256xf32, #tpu.memory_space<vmem>>, %arg3: memref<32x4xf32, #tpu.memory_space<vmem>>, %arg4: memref<32x1xf32, #tpu.memory_space<vmem>>, %arg5: memref<4x32xf32, #tpu.memory_space<vmem>>, %arg6: memref<4x1xf32, #tpu.memory_space<vmem>>, %arg7: memref<1x4x256xf32, #tpu.memory_space<vmem>>) attributes {dimension_semantics = [#tpu.dimension_semantics<parallel>, #tpu.dimension_semantics<parallel>], iteration_bounds = array<i64: 2, 1>, scalar_prefetch = 0 : i64, scratch_operands = 0 : i64, tpu.core_type = #tpu.core_type<tc>, window_params = [{transform_indices = @transform_0, window_bounds = array<i64: 1, 4, 256>}, {pipeline_mode = #tpu.pipeline_mode<synchronous>, transform_indices = @transform_1, window_bounds = array<i64: 32, 4>}, {pipeline_mode = #tpu.pipeline_mode<synchronous>, transform_indices = @transform_2, window_bounds = array<i64: 32, 1>}, {pipeline_mode = #tpu.pipeline_mode<synchronous>, transform_indices = @transform_3, window_bounds = array<i64: 4, 32>}, {pipeline_mode = #tpu.pipeline_mode<synchronous>, transform_indices = @transform_4, window_bounds = array<i64: 4, 1>}, {transform_indices = @transform_5, window_bounds = array<i64: 1, 4, 256>}]} {
    %c0 = arith.constant 0 : index
    %c0_0 = arith.constant 0 : index
    %c0_1 = arith.constant 0 : index
    %0 = vector.load %arg2[%c0, %c0_0, %c0_1] : memref<1x4x256xf32, #tpu.memory_space<vmem>>, vector<1x4x256xf32>
    %1 = vector.shape_cast %0 : vector<1x4x256xf32> to vector<4x256xf32>
    %c0_2 = arith.constant 0 : index
    %c0_3 = arith.constant 0 : index
    %2 = vector.load %arg3[%c0_2, %c0_3] : memref<32x4xf32, #tpu.memory_space<vmem>>, vector<32x4xf32>
    %cst = arith.constant dense<0.000000e+00> : vector<32x256xf32>
    %3 = tpu.matmul %2, %1, %cst {dimension_numbers = #tpu.dot_dimension_numbers<[1], [0], [0], [1], [0, 0, 1, 1], [], []>} : vector<32x4xf32>, vector<4x256xf32>, vector<32x256xf32> -> vector<32x256xf32>
    %c0_4 = arith.constant 0 : index
    %c0_5 = arith.constant 0 : index
    %4 = vector.load %arg4[%c0_4, %c0_5] : memref<32x1xf32, #tpu.memory_space<vmem>>, vector<32x1xf32>
    %5 = vector.broadcast %4 : vector<32x1xf32> to vector<32x256xf32>
    %6 = arith.addf %3, %5 : vector<32x256xf32>
    %cst_6 = arith.constant 0.000000e+00 : f32
    %cst_7 = arith.constant 6.000000e+00 : f32
    %7 = vector.broadcast %cst_6 : f32 to vector<32x256xf32>
    %8 = arith.maximumf %7, %6 : vector<32x256xf32>
    %9 = vector.broadcast %cst_7 : f32 to vector<32x256xf32>
    %10 = arith.minimumf %9, %8 : vector<32x256xf32>
    %c0_8 = arith.constant 0 : index
    %c0_9 = arith.constant 0 : index
    %11 = vector.load %arg5[%c0_8, %c0_9] : memref<4x32xf32, #tpu.memory_space<vmem>>, vector<4x32xf32>
    %cst_10 = arith.constant dense<0.000000e+00> : vector<4x256xf32>
    %12 = tpu.matmul %11, %10, %cst_10 {dimension_numbers = #tpu.dot_dimension_numbers<[1], [0], [0], [1], [0, 0, 1, 1], [], []>} : vector<4x32xf32>, vector<32x256xf32>, vector<4x256xf32> -> vector<4x256xf32>
    %c0_11 = arith.constant 0 : index
    %c0_12 = arith.constant 0 : index
    %13 = vector.load %arg6[%c0_11, %c0_12] : memref<4x1xf32, #tpu.memory_space<vmem>>, vector<4x1xf32>
    %14 = vector.broadcast %13 : vector<4x1xf32> to vector<4x256xf32>
    %15 = arith.addf %12, %14 : vector<4x256xf32>
    %c0_13 = arith.constant 0 : index
    %c0_14 = arith.constant 0 : index
    %c0_15 = arith.constant 0 : index
    %16 = vector.load %arg7[%c0_13, %c0_14, %c0_15] : memref<1x4x256xf32, #tpu.memory_space<vmem>>, vector<1x4x256xf32>
    %17 = vector.shape_cast %16 : vector<1x4x256xf32> to vector<4x256xf32>
    %18 = vector.shape_cast %15 : vector<4x256xf32> to vector<1x4x256xf32>
    tpu.vector_store %arg7[%c0_13, %c0_14, %c0_15], %18 {strides = array<i32>} : memref<1x4x256xf32, #tpu.memory_space<vmem>>, vector<1x4x256xf32>,
    return
  }
  func.func @transform_0(%arg0: i32, %arg1: i32) -> (i32, i32, i32) {
    %c0_i32 = arith.constant 0 : i32
    %c0_i32_0 = arith.constant 0 : i32
    return %arg0, %c0_i32, %arg1 : i32, i32, i32
  }
  func.func @transform_1(%arg0: i32, %arg1: i32) -> (i32, i32) {
    %c0_i32 = arith.constant 0 : i32
    %c0_i32_0 = arith.constant 0 : i32
    %c0_i32_1 = arith.constant 0 : i32
    return %c0_i32, %c0_i32_0 : i32, i32
  }
  func.func @transform_2(%arg0: i32, %arg1: i32) -> (i32, i32) {
    %c0_i32 = arith.constant 0 : i32
    %c0_i32_0 = arith.constant 0 : i32
    %c0_i32_1 = arith.constant 0 : i32
    return %c0_i32, %c0_i32_0 : i32, i32
  }
  func.func @transform_3(%arg0: i32, %arg1: i32) -> (i32, i32) {
    %c0_i32 = arith.constant 0 : i32
    %c0_i32_0 = arith.constant 0 : i32
    %c0_i32_1 = arith.constant 0 : i32
    return %c0_i32, %c0_i32_0 : i32, i32
  }
  func.func @transform_4(%arg0: i32, %arg1: i32) -> (i32, i32) {
    %c0_i32 = arith.constant 0 : i32
    %c0_i32_0 = arith.constant 0 : i32
    %c0_i32_1 = arith.constant 0 : i32
    return %c0_i32, %c0_i32_0 : i32, i32
  }
  func.func @transform_5(%arg0: i32, %arg1: i32) -> (i32, i32, i32) {
    %c0_i32 = arith.constant 0 : i32
    %c0_i32_0 = arith.constant 0 : i32
    return %arg0, %c0_i32, %arg1 : i32, i32, i32
  }
}

</mosaic_0001>

<bundles_post_ra>
// kernel: mlp_pallas.1
= control target key start
LH: loop header
LB: loop body
LE: loop exit
PB: predicated region body
PF: predicated region fallthrough
CT: control target
= control target key end

     0   :  { %s705_s18 = smov 0   ;;  %s707_s19 = smov 0   ;;  %s775_s0 = inlined_call_operand.vmem [shape: f32[2,4,256], index: 0, kind: input, shape index: {}]   ;;  %s776_s1 = inlined_call_operand.vmem [shape: f32[32,4], index: 1, kind: input, shape index: {}]   ;;  %s777_s2 = inlined_call_operand.vmem [shape: f32[32,1], index: 2, kind: input, shape index: {}]   ;;  %s778_s3 = inlined_call_operand.vmem [shape: f32[4,32], index: 3, kind: input, shape index: {}]   ;;  %s779_s4 = inlined_call_operand.vmem [shape: f32[4,1], index: 4, kind: input, shape index: {}]   ;;  %s780_s5 = inlined_call_operand.vmem [shape: f32[2,4,256], index: 5, kind: output, shape index: {}]  }
   0x1   :  { %s709_s20 = smov 0  }
   0x2 LB: > { %s27_s21 = sadd.s32 1, %s667_s19  ;;  %p596_p0 = scmp.ge.s32.totalorder %s671_s20, 1  ;;  %s671_s20 = sphi %s709_s20, %s15_s20   ;;  %s667_s19 = sphi %s707_s19, %s782_s19   ;;  %s663_s18 = sphi %s705_s18, %s781_s18  }
   0x3   : > { %p29_p1 = scmp.ge.s32.totalorder %s27_s21, 2  ;;  %p208_p2 = scmp.lt.s32.totalorder %s671_s20, 3 }
   0x5   : > { %s784_s21 = smov (%p29_p1, %s27_s21), 0  ;;  %p209_p3 = pnand %p596_p0, %p208_p2 }
   0x6   : > { %p245_p4 = scmp.lt.s32.totalorder (!%p209_p3), %s663_s18, 1  ;;  %v673_v0 = vmov (!%p209_p3), 0.0   ;;  %v269_v1 = vld [vmem:[%s777_s2] sm:$0xff] (!%p209_p3)  ;;  %v674_v2 = vmov (!%p209_p3), 0   ;;  %v271_v3 = vld [vmem:[%s777_s2 + $0x10] sm:$0xff] (!%p209_p3)  ;;  %v270_v4 = vld [vmem:[%s777_s2 + $0x8] sm:$0xff] (!%p209_p3) }
   0x7   : > { %212 = sbr.rel (%p209_p3) target bundleno = 477 (0x1dd), region = 40  ;;  %377 = vmatprep.mubr.f32.mxu0 (!%p209_p3), %v673_v0  ;;  %493 = vmatprep.mubr.f32.mxu1 (!%p209_p3), %v673_v0  ;;  %v272_v5 = vld [vmem:[%s777_s2 + $0x18] sm:$0xff] (!%p209_p3)  ;;  %vm308_vm0 = vcmask (!%p209_p3), 1043456   ;;  %v265_v8 = vld [vmem:[%s776_s1] sm:$0xff] (!%p209_p3)  ;;  %vm295_vm1 = vcmask (!%p209_p3), 31744   ;;  %v266_v10 = vld [vmem:[%s776_s1 + $0x8] sm:$0xff] (!%p209_p3) }
   0x8   : > { %646 = vset.pattern.permute.xlu0 (!%p209_p3), %v674_v2  ;;  %647 = vset.pattern.permute.xlu1 (!%p209_p3), %v674_v2  ;;  %v419_v9 = vld [vmem:[%s779_s4] sm:$0xf] (!%p209_p3)  ;;  %v267_v11 = vld [vmem:[%s776_s1 + $0x10] sm:$0xff] (!%p209_p3)  ;;  %v268_v12 = vld [vmem:[%s776_s1 + $0x18] sm:$0xff] (!%p209_p3)  ;;  %vm425_vm2 = vcmask (!%p209_p3), 261120  }
   0x9   : > { %275 = vperm.xlu0 (!%p209_p3), %646, %v269_v1   ;;  %285 = vperm.xlu1 (!%p209_p3), %647, %v271_v3   ;;  %v418_v53 = vld [vmem:[%s778_s3] sm:$0xf] (!%p209_p3) }
   0xd   : > { %280 = vperm.xlu0 (!%p209_p3), %646, %v270_v4   ;;  %290 = vperm.xlu1 (!%p209_p3), %647, %v272_v5  }
   0xe   : > { %s786_s18 = smov (!%p245_p4, %s663_s18), 1 }
   0xf   : > { %s610_s26 = sshll.u32 %s786_s18, 3 }
  0x10   : > { %s252_s8 = scalar_lea.vmem %s775_s0, %s610_s26  ;;  %s262_s28 = scalar_lea.vmem %s780_s5, %s610_s26 }
  0x11   : > { %v264_v6 = vld [vmem:[%s252_s8] sm:$0xff]  ;;  %422 = vperm.xlu0 %646, %v419_v9  }
  0x12   : > { %v294_v7 = vcombine.high %v264_v6, %v264_v6 }
  0x14   : > { %601 = vmatprep.subr.msk.mxu0 %vm308_vm0, %v294_v7 }
  0x15   : > { %602 = vmatpush1.msk.msra.mxu0 %vm308_vm0, %v264_v6 }
  0x16   : > { %603 = vmatmul.mubr.msk.f32.vlgmr.msra.gmra.mrb[0].mxu0 %vm295_vm1, %v265_v8 }
  0x17   : > { %383 = vmatprep.mubr.f32.mxu0 %v673_v0 }
  0x1a   : > { %604 = vmatmul.mubr.msk.f32.gmra.mrb[2].mxu0 %vm295_vm1, %v266_v10 }
  0x1b   : > { %389 = vmatprep.mubr.f32.mxu0 %v673_v0 }
  0x1e   : > { %605 = vmatmul.mubr.msk.f32.gmra.mrb[4].mxu0 %vm295_vm1, %v267_v11 }
  0x1f   : > { %395 = vmatprep.mubr.f32.mxu0 %v673_v0 }
  0x22   : > { %606 = vmatmul.mubr.msk.f32.gmra.mrb[6].mxu0 %vm295_vm1, %v268_v12 }
  0x88   : > { %v276_v13 = vpop.permute.xlu0 %275  ;;  %v286_v24 = vpop.permute.xlu1 %285 }
  0x8c   : > { %v281_v18 = vpop.permute.xlu0 %280  ;;  %v291_v37 = vpop.permute.xlu1 %290 }
  0x90   : > { %v423_v54 = vpop.permute.xlu0 %422 }
  0xe9   : > { %v379_v14 = vpop.f32.mrb[0].mxu0 }
  0xea   : > { %v380_v15 = vadd.f32 %v379_v14, %v276_v13  ;;  %v381_v16 = vpop.f32.mrb[1].mxu0 }
  0xeb   : > { %v382_v17 = vadd.f32 %v381_v16, %v276_v13 }
  0xec   : > { %v402_v20 = vmax.f32 %v380_v15, 0.0 }
  0xed   : > { %v385_v19 = vpop.f32.mrb[2].mxu0  ;;  %v403_v23 = vmax.f32 %v382_v17, 0.0 }
  0xee   : > { %v386_v21 = vadd.f32 %v385_v19, %v281_v18  ;;  %v387_v22 = vpop.f32.mrb[3].mxu0  ;;  %v410_v29 = vmin.f32 %v402_v20, 6.0 }
  0xef   : > { %v388_v25 = vadd.f32 %v387_v22, %v281_v18  ;;  %v411_v33 = vmin.f32 %v403_v23, 6.0 }
  0xf0   : > { %v404_v26 = vmax.f32 %v386_v21, 0.0 }
  0xf1   : > { %v405_v27 = vmax.f32 %v388_v25, 0.0  ;;  %v391_v28 = vpop.f32.mrb[4].mxu0 }
  0xf2   : > { %v412_v30 = vmin.f32 %v404_v26, 6.0  ;;  %v392_v31 = vadd.f32 %v391_v28, %v286_v24  ;;  %v393_v32 = vpop.f32.mrb[5].mxu0 }
  0xf3   : > { %v413_v34 = vmin.f32 %v405_v27, 6.0  ;;  %v394_v35 = vadd.f32 %v393_v32, %v286_v24 }
  0xf4   : > { %v614_v36 = vpack.c.bf16 %v412_v30, %v410_v29  ;;  %v406_v40 = vmax.f32 %v392_v31, 0.0 }
  0xf5   : > { %v397_v38 = vpop.f32.mrb[6].mxu0  ;;  %v612_v39 = vpack.c.bf16 %v413_v34, %v411_v33  ;;  %v407_v43 = vmax.f32 %v394_v35, 0.0 }
  0xf6   : > { %v398_v41 = vadd.f32 %v397_v38, %v291_v37  ;;  %v399_v42 = vpop.f32.mrb[7].mxu0  ;;  %v414_v47 = vmin.f32 %v406_v40, 6.0 }
  0xf7   : > { %v400_v44 = vadd.f32 %v399_v42, %v291_v37  ;;  %613 = vmatprep.subr.bf16.mxu1 %v612_v39  ;;  %v415_v49 = vmin.f32 %v407_v43, 6.0 }
  0xf8   : > { %v408_v45 = vmax.f32 %v398_v41, 0.0  ;;  %615 = vmatpush1.bf16.msra.mxu1 %v614_v36 }
  0xf9   : > { %v409_v46 = vmax.f32 %v400_v44, 0.0 }
  0xfa   : > { %v416_v48 = vmin.f32 %v408_v45, 6.0 }
  0xfb   : > { %v417_v50 = vmin.f32 %v409_v46, 6.0 }
  0xfc   : > { %v618_v51 = vpack.c.bf16 %v416_v48, %v414_v47 }
  0xfd   : > { %v616_v52 = vpack.c.bf16 %v417_v50, %v415_v49 }
  0xff   : > { %617 = vmatprep.subr.bf16.mxu1 %v616_v52 }
 0x100   : > { %619 = vmatpush1.bf16.msra.mxu1 %v618_v51 }
 0x103   : > { %607 = vmatmul.mubr.msk.f32.vlgmr.msra.gmra.mrb[0].mxu1 %vm425_vm2, %v418_v53 }
 0x1d6   : > { %v495_v55 = vpop.f32.mrb[0].mxu1 }
 0x1d7   : > { %v496_v56 = vadd.f32 %v495_v55, %v423_v54  ;;  %v497_v57 = vpop.f32.mrb[1].mxu1 }
 0x1d8   : > { %v498_v58 = vadd.f32 %v497_v57, %v423_v54 }
 0x1da   : > { %v502_v59 = vcombine.low %v496_v56, %v498_v58 }
 0x1dc   : > { %504 = vst [vmem:[%s262_s28] sm:$0xff] %v502_v59 }
 0x1dd PF: > { %s15_s20 = sadd.s32 1, %s671_s20   ;;  %s781_s18 = smov %s667_s19 }
 0x1de   : > { %p12_p5 = scmp.ge.s32.totalorder %s15_s20, 4   ;;  %s782_s19 = smov %s784_s21 }
 0x1e0   :  { %14 = sbr.rel (!%p12_p5) target bundleno = 2 (0x2), region = 70 }

</bundles_post_ra>
